<compile_context>
chip_gen: v6e
topology: v6e:2x2x1
jax: 0.10.0
libtpu: 0.0.40
codegen_flags: <defaults>
</compile_context>

<pallas_src>
import math

import numpy as np
import jax
import jax.numpy as jnp
from jax.experimental import pallas as pl
from jax.experimental.pallas import tpu as pltpu

# ---- model / problem dimensions (small, consistent with the module) --------
B, N = 2, 8            # batch_size, station_num
NFEAT = 8              # nfeat (LS_GNN in_dim)
NHID = 8               # nhidden (must equal NFEAT for the reference wiring)
E_H, E_OUT = 32, 30    # GraphGNN edge_mlp hidden / out
E_PAD = 32             # E_OUT padded to 32 so the one layout transpose is tile-aligned
GNN_OUT = 13           # LS_GNN.gnn_out
HID_DIM = 64           # LS_GNN.hid_dim (GRU hidden)
OUT_DIM = 1            # LS_GNN.out_dim
PRED_LEN = 1           # npred; outer forward never supplies `feature`,
                       # so only step i == 0 is well defined
HIST_LEN = 4           # unused when PRED_LEN == 1
GIN = GNN_OUT + NHID   # GRU input size
M = B * N              # 16 nodes total (batch folded into rows)
E_TOT = B * N * N      # 128 edges total (full grid, lane-dense)

F32 = jnp.float32
assert NFEAT == NHID, "reference model requires nhidden == nfeat"
assert PRED_LEN == 1

# ---------------------------------------------------------------------------
# Parameter slab: every weight/bias/constant lives in ONE (88, 192) f32 array
# (single DMA); entries are explicit (row, col, nrows, ncols) rectangles.
# w_hh is intentionally NOT packed: it is dead while h0 == 0 (restore it if
# multi-step hidden-state carry is ever added).
# ---------------------------------------------------------------------------
SLAB_ROWS, SLAB_COLS = 88, 192
PARAM_LAYOUT = {
    # name:        (row, col, nrows, ncols)
    "w_ih_g":      (0,    0, GNN_OUT, 3 * HID_DIM),   # (13, 192)  GRU w_ih rows for xn_gnn
    "b_ih_eff":    (13,   0, 1, 3 * HID_DIM),         # b_ih with b_hh[r,z] folded in
    "b_hh_n":      (14,   0, 1, HID_DIM),             # n-gate hidden bias (multiplied by r)
    "b3":          (14,  64, 1, GNN_OUT),
    "b_out":       (14,  77, 1, OUT_DIM),
    "w_ih_x":      (16,   0, NHID, 3 * HID_DIM),      # (8, 192)   GRU w_ih rows for x
    "RsT":         (24,   0, M, E_TOT),               # (16, 128)  edge<-source replication
    "RtT":         (40,   0, M, E_TOT),               # (16, 128)  edge<-target replication
    "S":           (56,   0, M, E_TOT),               # (16, 128)  signed incidence (+tgt, -src)
    "w1_bothT":    (24, 128, 2 * E_H, NHID),          # (64, 8)    [w1_src^T ; w1_tgt^T]
    "w2T_pad":     (24, 136, E_PAD, E_H),             # (32, 32)   rows 30..31 zero
    "wb_cols":     (24, 168, E_H, 2),                 # (32, 2)    [w1_w^T , b1^T] columns
    "b2_col_pad":  (24, 170, E_PAD, 1),               # (32, 1)    rows 30..31 zero
    "w3_pad":      (24, 171, E_PAD, GNN_OUT),         # (32, 13)   rows 30..31 zero
    "w_out":       (24, 184, HID_DIM, OUT_DIM),       # (64, 1)
    "gcn_w":       (56, 136, NFEAT, NHID),            # (8, 8)
    "gcn_wT":      (56, 144, NHID, NFEAT),            # (8, 8)
}


def pack_params(entries):
    occ = np.zeros((SLAB_ROWS, SLAB_COLS), dtype=bool)
    slab = np.zeros((SLAB_ROWS, SLAB_COLS), dtype=np.float32)
    for name, (r, c, nr, nc) in PARAM_LAYOUT.items():
        val = np.asarray(entries[name], dtype=np.float32)
        assert val.shape == (nr, nc), (name, val.shape, (nr, nc))
        assert r + nr <= SLAB_ROWS and c + nc <= SLAB_COLS, name
        assert not occ[r:r + nr, c:c + nc].any(), f"slab overlap at {name}"
        occ[r:r + nr, c:c + nc] = True
        slab[r:r + nr, c:c + nc] = val
    return jnp.asarray(slab)


# ---------------------------------------------------------------------------
# Fused kernel: GCNLayer+ReLU -> GraphGNN -> GRUCell -> fc_out (one launch).
# ---------------------------------------------------------------------------
def _ls_gnn_gcn_kernel(x_ref, xT_ref, adj2_ref, extras_ref, p_ref, y_ref):
    def P(name):
        r, c, nr, nc = PARAM_LAYOUT[name]
        return p_ref[r:r + nr, c:c + nc]            # static slice of the param slab

    x = x_ref[...]                                  # (M, NFEAT)   batch folded into rows
    xT = xT_ref[...]                                # (NFEAT, M)
    adj2 = adj2_ref[...]                            # (2M, M): [adj_blk ; adj_blk^T]
    adj_blk = adj2[0:M, :]
    adj_blkT = adj2[M:2 * M, :]
    extras = extras_ref[...]                        # (2, E_TOT): [per-edge adj ; ones]

    # ---- 1) GCNLayer + ReLU (dropout identity in eval), row + transposed forms
    support = jnp.dot(x, P("gcn_w"), preferred_element_type=F32)               # (M, NHID)
    xg = jnp.maximum(jnp.dot(adj_blk, support, preferred_element_type=F32), 0.0)
    supportT = jnp.dot(P("gcn_wT"), xT, preferred_element_type=F32)            # (NHID, M)
    xgT = jnp.maximum(jnp.dot(supportT, adj_blkT, preferred_element_type=F32), 0.0)

    # ---- 2) GraphGNN edge MLP, edges on the LANE axis (lane-dense sigmoids) --
    a_bothT = jnp.dot(P("w1_bothT"), xgT, preferred_element_type=F32)          # (2*E_H, M)
    h1T = jax.nn.sigmoid(
        jnp.dot(a_bothT[0:E_H, :], P("RsT"), preferred_element_type=F32)
        + jnp.dot(a_bothT[E_H:2 * E_H, :], P("RtT"), preferred_element_type=F32)
        + jnp.dot(P("wb_cols"), extras, preferred_element_type=F32))           # (E_H, E_TOT)
    h2T = jax.nn.sigmoid(
        jnp.dot(P("w2T_pad"), h1T, preferred_element_type=F32)
        + P("b2_col_pad"))                                                     # (E_PAD, E_TOT)

    # scatter_add(+, target) + scatter_add(-, source) == signed incidence matmul
    h2 = h2T.T                                      # tile-aligned (32,128)->(128,32) transpose
    agg = jnp.dot(P("S"), h2, preferred_element_type=F32)                      # (M, E_PAD)
    xn_gnn = jax.nn.sigmoid(
        jnp.dot(agg, P("w3_pad"), preferred_element_type=F32) + P("b3"))       # (M, GNN_OUT)

    # ---- 3) GRUCell (PyTorch gate order r,z,n; h0 == 0 => gh == b_hh) --------
    # concat([xn_gnn, x]) @ w_ih  ==  xn_gnn @ w_ih[:13] + x @ w_ih[13:]
    gi = (jnp.dot(xn_gnn, P("w_ih_g"), preferred_element_type=F32)
          + jnp.dot(xg, P("w_ih_x"), preferred_element_type=F32)
          + P("b_ih_eff"))                                                     # (M, 3H)
    H = HID_DIM
    rz = jax.nn.sigmoid(gi[:, 0:2 * H])             # r and z in one lane-dense sigmoid
    r = rz[:, 0:H]
    z = rz[:, H:2 * H]
    n = jnp.tanh(gi[:, 2 * H:3 * H] + r * P("b_hh_n"))
    h_new = (1.0 - z) * n                           # + z * h_prev, exactly 0 for h0 == 0

    # ---- 4) fc_out -----------------------------------------------------------
    y_ref[...] = (jnp.dot(h_new, P("w_out"), preferred_element_type=F32)
                  + P("b_out"))                                                # (M, OUT_DIM)


def ls_gnn_gcn_forward(x, adj, param_slab):
    xf = x.reshape(M, NFEAT).astype(F32)
    xT = xf.T                                                       # (NFEAT, M)
    adj_blk = jnp.kron(jnp.eye(B, dtype=F32), adj)                  # (M, M) block-diagonal
    adj2 = jnp.concatenate([adj_blk, adj_blk.T], axis=0)            # (2M, M)
    adj_edge = jnp.tile(adj.reshape(1, N * N), (1, B))              # (1, E_TOT)
    extras = jnp.concatenate([adj_edge, jnp.ones_like(adj_edge)], axis=0)  # (2, E_TOT)

    # TODO(synk): for steps > 0 the reference LS_GNN needs a `feature` tensor
    # that LS_GNN_GCN.forward never supplies; only PRED_LEN == 1 is well defined.
    y = pl.pallas_call(
        _ls_gnn_gcn_kernel,
        out_shape=jax.ShapeDtypeStruct((M, OUT_DIM), F32),
        grid_spec=pltpu.PrefetchScalarGridSpec(
            num_scalar_prefetch=0,
            grid=(1,),
            in_specs=[
                pl.BlockSpec((M, NFEAT), lambda g: (0, 0)),
                pl.BlockSpec((NFEAT, M), lambda g: (0, 0)),
                pl.BlockSpec((2 * M, M), lambda g: (0, 0)),
                pl.BlockSpec((2, E_TOT), lambda g: (0, 0)),
                pl.BlockSpec((SLAB_ROWS, SLAB_COLS), lambda g: (0, 0)),
            ],
            out_specs=pl.BlockSpec((M, OUT_DIM), lambda g: (0, 0)),
        ),
        compiler_params=pltpu.CompilerParams(
            dimension_semantics=("arbitrary",)),
    )(xf, xT, adj2, extras, param_slab)
    return y.reshape(B, PRED_LEN, N, OUT_DIM)


# ---------------------------------------------------------------------------
# Parameters (deterministic, synthetic). Unused reference params (GraphGNN.w/.b,
# LS_GNN.fc_in, LS_GNN.fc_out_encoder) are dead in forward and omitted.
# ---------------------------------------------------------------------------
def init_params(key):
    ks = jax.random.split(key, 12)

    def xavier(k, shape):
        a = math.sqrt(6.0 / (shape[0] + shape[1]))
        return jax.random.uniform(k, shape, F32, -a, a)

    def unif(k, shape, bound):
        return jax.random.uniform(k, shape, F32, -bound, bound)

    p = {}
    p["gcn_w"] = xavier(ks[0], (NFEAT, NHID))
    p["w1"] = xavier(ks[1], (2 * NFEAT + 1, E_H))        # edge_mlp Linear 1 (in, out)
    p["b1"] = unif(ks[2], (1, E_H), 1.0 / math.sqrt(2 * NFEAT + 1))
    p["w2"] = xavier(ks[3], (E_H, E_OUT))
    p["b2"] = unif(ks[4], (1, E_OUT), 1.0 / math.sqrt(E_H))
    p["w3"] = xavier(ks[5], (E_OUT, GNN_OUT))
    p["b3"] = unif(ks[6], (1, GNN_OUT), 1.0 / math.sqrt(E_OUT))
    kg = 1.0 / math.sqrt(HID_DIM)
    p["w_ih"] = unif(ks[7], (GIN, 3 * HID_DIM), kg)      # (in, 3H); gate order r, z, n
    p["w_hh"] = unif(ks[8], (HID_DIM, 3 * HID_DIM), kg)  # dead while h0 == 0 (not packed)
    p["b_ih"] = unif(ks[9], (1, 3 * HID_DIM), kg)
    p["b_hh"] = unif(ks[10], (1, 3 * HID_DIM), kg)
    p["w_out"] = xavier(ks[11], (HID_DIM, OUT_DIM))
    p["b_out"] = jnp.zeros((1, OUT_DIM), F32)
    return p


def make_slab_entries(p):
    # Full (src, tgt) edge grid constants, edge order e = b*N*N + s*N + t.
    e = np.arange(E_TOT)
    b_i = e // (N * N)
    s_i = (e // N) % N
    t_i = e % N
    src_g = b_i * N + s_i
    tgt_g = b_i * N + t_i
    RsT = np.zeros((M, E_TOT), np.float32); RsT[src_g, e] = 1.0
    RtT = np.zeros((M, E_TOT), np.float32); RtT[tgt_g, e] = 1.0
    S = np.zeros((M, E_TOT), np.float32)
    S[tgt_g, e] += 1.0           # scatter_add(+, target)
    S[src_g, e] -= 1.0           # scatter_add(-, source)

    w1 = np.asarray(p["w1"])                              # (17, 32)
    entries = {
        "gcn_w": p["gcn_w"],
        "gcn_wT": np.asarray(p["gcn_w"]).T,
        "w1_bothT": np.concatenate([w1[:NFEAT].T, w1[NFEAT:2 * NFEAT].T], axis=0),   # (64, 8)
        "wb_cols": np.concatenate([w1[2 * NFEAT:].T, np.asarray(p["b1"]).T], axis=1),  # (32, 2)
        "RsT": RsT, "RtT": RtT, "S": S,
        "b3": p["b3"],
        "w_ih_g": np.asarray(p["w_ih"])[:GNN_OUT],
        "w_ih_x": np.asarray(p["w_ih"])[GNN_OUT:],
        "b_hh_n": np.asarray(p["b_hh"])[:, 2 * HID_DIM:],
        "w_out": p["w_out"],
        "b_out": p["b_out"],
    }
    w2T_pad = np.zeros((E_PAD, E_H), np.float32)
    w2T_pad[:E_OUT] = np.asarray(p["w2"]).T
    entries["w2T_pad"] = w2T_pad
    b2_col_pad = np.zeros((E_PAD, 1), np.float32)
    b2_col_pad[:E_OUT, 0] = np.asarray(p["b2"]).reshape(-1)
    entries["b2_col_pad"] = b2_col_pad
    w3_pad = np.zeros((E_PAD, GNN_OUT), np.float32)
    w3_pad[:E_OUT] = np.asarray(p["w3"])
    entries["w3_pad"] = w3_pad
    b_ih_eff = np.asarray(p["b_ih"]).copy()
    b_ih_eff[:, :2 * HID_DIM] += np.asarray(p["b_hh"])[:, :2 * HID_DIM]
    entries["b_ih_eff"] = b_ih_eff
    return entries


# Pure-JAX reference of the original forward (eval mode, full edge grid).
def _reference_forward(x, adj, p):
    xf = x.reshape(M, NFEAT)
    support = xf @ p["gcn_w"]
    xg = jnp.concatenate(
        [jnp.maximum(adj @ support[b * N:(b + 1) * N], 0.0) for b in range(B)], 0)
    outs = []
    for b in range(B):
        xb = xg[b * N:(b + 1) * N]
        src = jnp.repeat(xb, N, axis=0)
        tgt = jnp.tile(xb, (N, 1))
        ew = adj.reshape(N * N, 1)
        feat = jnp.concatenate([src, tgt, ew], axis=1)
        h1 = jax.nn.sigmoid(feat @ p["w1"] + p["b1"])
        h2 = jax.nn.sigmoid(h1 @ p["w2"] + p["b2"]).reshape(N, N, E_OUT)
        agg = h2.sum(0) - h2.sum(1)
        outs.append(jax.nn.sigmoid(agg @ p["w3"] + p["b3"]))
    xn_gnn = jnp.concatenate(outs, 0)
    gi = jnp.concatenate([xn_gnn, xg], axis=1) @ p["w_ih"] + p["b_ih"]
    gh = p["b_hh"]                                        # h0 == 0
    H = HID_DIM
    r = jax.nn.sigmoid(gi[:, :H] + gh[:, :H])
    z = jax.nn.sigmoid(gi[:, H:2 * H] + gh[:, H:2 * H])
    n = jnp.tanh(gi[:, 2 * H:] + r * gh[:, 2 * H:])
    h = (1.0 - z) * n
    y = h @ p["w_out"] + p["b_out"]
    return y.reshape(B, PRED_LEN, N, OUT_DIM)


if __name__ == "__main__":
    key = jax.random.PRNGKey(0)
    kx, ka, kp = jax.random.split(key, 3)

    x = jax.random.normal(kx, (B, N, NFEAT), F32)
    # strictly positive adjacency -> dense_to_sparse yields the full N*N edge grid
    node_adj = jax.random.uniform(ka, (N, N), F32) + 0.1

    params = init_params(kp)
    slab = pack_params(make_slab_entries(params))

    out = ls_gnn_gcn_forward(x, node_adj, slab)
    jax.block_until_ready(out)
    assert out.shape == (B, PRED_LEN, N, OUT_DIM) and out.dtype == F32
    assert bool(jnp.all(jnp.isfinite(out)))

    ref = _reference_forward(x, node_adj, params)
    assert float(jnp.max(jnp.abs(out - ref))) < 3e-2, "mismatch vs reference forward"

    print("KERNEL_OK")
</pallas_src>

<mosaic_0001>
module attributes {stable_mosaic.version = 11 : i64} {
  func.func @_ls_gnn_gcn_kernel(%arg0: i32, %arg1: memref<16x8xf32, #tpu.memory_space<vmem>>, %arg2: memref<8x16xf32, #tpu.memory_space<vmem>>, %arg3: memref<32x16xf32, #tpu.memory_space<vmem>>, %arg4: memref<2x128xf32, #tpu.memory_space<vmem>>, %arg5: memref<88x192xf32, #tpu.memory_space<vmem>>, %arg6: memref<16x1xf32, #tpu.memory_space<vmem>>) attributes {dimension_semantics = [#tpu.dimension_semantics<arbitrary>], iteration_bounds = array<i64: 1>, scalar_prefetch = 0 : i64, scratch_operands = 0 : i64, tpu.core_type = #tpu.core_type<tc>, window_params = [{pipeline_mode = #tpu.pipeline_mode<synchronous>, transform_indices = @transform_0, window_bounds = array<i64: 16, 8>}, {pipeline_mode = #tpu.pipeline_mode<synchronous>, transform_indices = @transform_1, window_bounds = array<i64: 8, 16>}, {pipeline_mode = #tpu.pipeline_mode<synchronous>, transform_indices = @transform_2, window_bounds = array<i64: 32, 16>}, {pipeline_mode = #tpu.pipeline_mode<synchronous>, transform_indices = @transform_3, window_bounds = array<i64: 2, 128>}, {pipeline_mode = #tpu.pipeline_mode<synchronous>, transform_indices = @transform_4, window_bounds = array<i64: 88, 192>}, {pipeline_mode = #tpu.pipeline_mode<synchronous>, transform_indices = @transform_5, window_bounds = array<i64: 16, 1>}]} {
    %c0 = arith.constant 0 : index
    %c0_0 = arith.constant 0 : index
    %0 = vector.load %arg1[%c0, %c0_0] : memref<16x8xf32, #tpu.memory_space<vmem>>, vector<16x8xf32>
    %c0_1 = arith.constant 0 : index
    %c0_2 = arith.constant 0 : index
    %1 = vector.load %arg2[%c0_1, %c0_2] : memref<8x16xf32, #tpu.memory_space<vmem>>, vector<8x16xf32>
    %c0_3 = arith.constant 0 : index
    %c0_4 = arith.constant 0 : index
    %2 = vector.load %arg3[%c0_3, %c0_4] : memref<32x16xf32, #tpu.memory_space<vmem>>, vector<32x16xf32>
    %3 = vector.extract_strided_slice %2 {offsets = [0, 0], sizes = [16, 16], strides = [1, 1]} : vector<32x16xf32> to vector<16x16xf32>
    %4 = vector.extract_strided_slice %2 {offsets = [16, 0], sizes = [16, 16], strides = [1, 1]} : vector<32x16xf32> to vector<16x16xf32>
    %c0_5 = arith.constant 0 : index
    %c0_6 = arith.constant 0 : index
    %5 = vector.load %arg4[%c0_5, %c0_6] : memref<2x128xf32, #tpu.memory_space<vmem>>, vector<2x128xf32>
    %c56 = arith.constant 56 : index
    %c136 = arith.constant 136 : index
    %6 = vector.load %arg5[%c56, %c136] : memref<88x192xf32, #tpu.memory_space<vmem>>, vector<8x8xf32>
    %cst = arith.constant dense<0.000000e+00> : vector<16x8xf32>
    %7 = tpu.matmul %0, %6, %cst {dimension_numbers = #tpu.dot_dimension_numbers<[1], [0], [0], [1], [0, 0, 1, 1], [], []>} : vector<16x8xf32>, vector<8x8xf32>, vector<16x8xf32> -> vector<16x8xf32>
    %cst_7 = arith.constant dense<0.000000e+00> : vector<16x8xf32>
    %8 = tpu.matmul %3, %7, %cst_7 {dimension_numbers = #tpu.dot_dimension_numbers<[1], [0], [0], [1], [0, 0, 1, 1], [], []>} : vector<16x16xf32>, vector<16x8xf32>, vector<16x8xf32> -> vector<16x8xf32>
    %cst_8 = arith.constant 0.000000e+00 : f32
    %9 = vector.broadcast %cst_8 : f32 to vector<16x8xf32>
    %10 = arith.maximumf %8, %9 : vector<16x8xf32>
    %c56_9 = arith.constant 56 : index
    %c144 = arith.constant 144 : index
    %11 = vector.load %arg5[%c56_9, %c144] : memref<88x192xf32, #tpu.memory_space<vmem>>, vector<8x8xf32>
    %cst_10 = arith.constant dense<0.000000e+00> : vector<8x16xf32>
    %12 = tpu.matmul %11, %1, %cst_10 {dimension_numbers = #tpu.dot_dimension_numbers<[1], [0], [0], [1], [0, 0, 1, 1], [], []>} : vector<8x8xf32>, vector<8x16xf32>, vector<8x16xf32> -> vector<8x16xf32>
    %cst_11 = arith.constant dense<0.000000e+00> : vector<8x16xf32>
    %13 = tpu.matmul %12, %4, %cst_11 {dimension_numbers = #tpu.dot_dimension_numbers<[1], [0], [0], [1], [0, 0, 1, 1], [], []>} : vector<8x16xf32>, vector<16x16xf32>, vector<8x16xf32> -> vector<8x16xf32>
    %cst_12 = arith.constant 0.000000e+00 : f32
    %14 = vector.broadcast %cst_12 : f32 to vector<8x16xf32>
    %15 = arith.maximumf %13, %14 : vector<8x16xf32>
    %c24 = arith.constant 24 : index
    %c128 = arith.constant 128 : index
    %16 = vector.load %arg5[%c24, %c128] : memref<88x192xf32, #tpu.memory_space<vmem>>, vector<64x8xf32>
    %cst_13 = arith.constant dense<0.000000e+00> : vector<64x16xf32>
    %17 = tpu.matmul %16, %15, %cst_13 {dimension_numbers = #tpu.dot_dimension_numbers<[1], [0], [0], [1], [0, 0, 1, 1], [], []>} : vector<64x8xf32>, vector<8x16xf32>, vector<64x16xf32> -> vector<64x16xf32>
    %18 = vector.extract_strided_slice %17 {offsets = [0, 0], sizes = [32, 16], strides = [1, 1]} : vector<64x16xf32> to vector<32x16xf32>
    %c24_14 = arith.constant 24 : index
    %c0_15 = arith.constant 0 : index
    %19 = vector.load %arg5[%c24_14, %c0_15] : memref<88x192xf32, #tpu.memory_space<vmem>>, vector<16x128xf32>
    %cst_16 = arith.constant dense<0.000000e+00> : vector<32x128xf32>
    %20 = tpu.matmul %18, %19, %cst_16 {dimension_numbers = #tpu.dot_dimension_numbers<[1], [0], [0], [1], [0, 0, 1, 1], [], []>} : vector<32x16xf32>, vector<16x128xf32>, vector<32x128xf32> -> vector<32x128xf32>
    %21 = vector.extract_strided_slice %17 {offsets = [32, 0], sizes = [32, 16], strides = [1, 1]} : vector<64x16xf32> to vector<32x16xf32>
    %c40 = arith.constant 40 : index
    %c0_17 = arith.constant 0 : index
    %22 = vector.load %arg5[%c40, %c0_17] : memref<88x192xf32, #tpu.memory_space<vmem>>, vector<16x128xf32>
    %cst_18 = arith.constant dense<0.000000e+00> : vector<32x128xf32>
    %23 = tpu.matmul %21, %22, %cst_18 {dimension_numbers = #tpu.dot_dimension_numbers<[1], [0], [0], [1], [0, 0, 1, 1], [], []>} : vector<32x16xf32>, vector<16x128xf32>, vector<32x128xf32> -> vector<32x128xf32>
    %24 = arith.addf %20, %23 : vector<32x128xf32>
    %c24_19 = arith.constant 24 : index
    %c168 = arith.constant 168 : index
    %25 = vector.load %arg5[%c24_19, %c168] : memref<88x192xf32, #tpu.memory_space<vmem>>, vector<32x2xf32>
    %cst_20 = arith.constant dense<0.000000e+00> : vector<32x128xf32>
    %26 = tpu.matmul %25, %5, %cst_20 {dimension_numbers = #tpu.dot_dimension_numbers<[1], [0], [0], [1], [0, 0, 1, 1], [], []>} : vector<32x2xf32>, vector<2x128xf32>, vector<32x128xf32> -> vector<32x128xf32>
    %27 = arith.addf %24, %26 : vector<32x128xf32>
    %28 = arith.negf %27 : vector<32x128xf32>
    %29 = math.exp %28 : vector<32x128xf32>
    %cst_21 = arith.constant 1.000000e+00 : f32
    %30 = vector.broadcast %cst_21 : f32 to vector<32x128xf32>
    %31 = arith.addf %30, %29 : vector<32x128xf32>
    %32 = arith.divf %30, %31 : vector<32x128xf32>
    %c24_22 = arith.constant 24 : index
    %c136_23 = arith.constant 136 : index
    %33 = vector.load %arg5[%c24_22, %c136_23] : memref<88x192xf32, #tpu.memory_space<vmem>>, vector<32x32xf32>
    %cst_24 = arith.constant dense<0.000000e+00> : vector<32x128xf32>
    %34 = tpu.matmul %33, %32, %cst_24 {dimension_numbers = #tpu.dot_dimension_numbers<[1], [0], [0], [1], [0, 0, 1, 1], [], []>} : vector<32x32xf32>, vector<32x128xf32>, vector<32x128xf32> -> vector<32x128xf32>
    %c24_25 = arith.constant 24 : index
    %c170 = arith.constant 170 : index
    %35 = vector.load %arg5[%c24_25, %c170] : memref<88x192xf32, #tpu.memory_space<vmem>>, vector<32x1xf32>
    %36 = vector.broadcast %35 : vector<32x1xf32> to vector<32x128xf32>
    %37 = arith.addf %34, %36 : vector<32x128xf32>
    %38 = arith.negf %37 : vector<32x128xf32>
    %39 = math.exp %38 : vector<32x128xf32>
    %cst_26 = arith.constant 1.000000e+00 : f32
    %40 = vector.broadcast %cst_26 : f32 to vector<32x128xf32>
    %41 = arith.addf %40, %39 : vector<32x128xf32>
    %42 = arith.divf %40, %41 : vector<32x128xf32>
    %43 = tpu.transpose %42, [1, 0] : vector<32x128xf32> -> vector<128x32xf32>
    %c56_27 = arith.constant 56 : index
    %c0_28 = arith.constant 0 : index
    %44 = vector.load %arg5[%c56_27, %c0_28] : memref<88x192xf32, #tpu.memory_space<vmem>>, vector<16x128xf32>
    %cst_29 = arith.constant dense<0.000000e+00> : vector<16x32xf32>
    %45 = tpu.matmul %44, %43, %cst_29 {dimension_numbers = #tpu.dot_dimension_numbers<[1], [0], [0], [1], [0, 0, 1, 1], [], []>} : vector<16x128xf32>, vector<128x32xf32>, vector<16x32xf32> -> vector<16x32xf32>
    %c24_30 = arith.constant 24 : index
    %c171 = arith.constant 171 : index
    %46 = vector.load %arg5[%c24_30, %c171] : memref<88x192xf32, #tpu.memory_space<vmem>>, vector<32x13xf32>
    %cst_31 = arith.constant dense<0.000000e+00> : vector<16x13xf32>
    %47 = tpu.matmul %45, %46, %cst_31 {dimension_numbers = #tpu.dot_dimension_numbers<[1], [0], [0], [1], [0, 0, 1, 1], [], []>} : vector<16x32xf32>, vector<32x13xf32>, vector<16x13xf32> -> vector<16x13xf32>
    %c14 = arith.constant 14 : index
    %c64 = arith.constant 64 : index
    %48 = vector.load %arg5[%c14, %c64] : memref<88x192xf32, #tpu.memory_space<vmem>>, vector<1x13xf32>
    %49 = vector.broadcast %48 : vector<1x13xf32> to vector<16x13xf32>
    %50 = arith.addf %47, %49 : vector<16x13xf32>
    %51 = arith.negf %50 : vector<16x13xf32>
    %52 = math.exp %51 : vector<16x13xf32>
    %cst_32 = arith.constant 1.000000e+00 : f32
    %53 = vector.broadcast %cst_32 : f32 to vector<16x13xf32>
    %54 = arith.addf %53, %52 : vector<16x13xf32>
    %55 = arith.divf %53, %54 : vector<16x13xf32>
    %c0_33 = arith.constant 0 : index
    %c0_34 = arith.constant 0 : index
    %56 = vector.load %arg5[%c0_33, %c0_34] : memref<88x192xf32, #tpu.memory_space<vmem>>, vector<13x192xf32>
    %cst_35 = arith.constant dense<0.000000e+00> : vector<16x192xf32>
    %57 = tpu.matmul %55, %56, %cst_35 {dimension_numbers = #tpu.dot_dimension_numbers<[1], [0], [0], [1], [0, 0, 1, 1], [], []>} : vector<16x13xf32>, vector<13x192xf32>, vector<16x192xf32> -> vector<16x192xf32>
    %c16 = arith.constant 16 : index
    %c0_36 = arith.constant 0 : index
    %58 = vector.load %arg5[%c16, %c0_36] : memref<88x192xf32, #tpu.memory_space<vmem>>, vector<8x192xf32>
    %cst_37 = arith.constant dense<0.000000e+00> : vector<16x192xf32>
    %59 = tpu.matmul %10, %58, %cst_37 {dimension_numbers = #tpu.dot_dimension_numbers<[1], [0], [0], [1], [0, 0, 1, 1], [], []>} : vector<16x8xf32>, vector<8x192xf32>, vector<16x192xf32> -> vector<16x192xf32>
    %60 = arith.addf %57, %59 : vector<16x192xf32>
    %c13 = arith.constant 13 : index
    %c0_38 = arith.constant 0 : index
    %61 = vector.load %arg5[%c13, %c0_38] : memref<88x192xf32, #tpu.memory_space<vmem>>, vector<1x192xf32>
    %62 = vector.broadcast %61 : vector<1x192xf32> to vector<16x192xf32>
    %63 = arith.addf %60, %62 : vector<16x192xf32>
    %64 = vector.extract_strided_slice %63 {offsets = [0, 0], sizes = [16, 128], strides = [1, 1]} : vector<16x192xf32> to vector<16x128xf32>
    %65 = arith.negf %64 : vector<16x128xf32>
    %66 = math.exp %65 : vector<16x128xf32>
    %cst_39 = arith.constant 1.000000e+00 : f32
    %67 = vector.broadcast %cst_39 : f32 to vector<16x128xf32>
    %68 = arith.addf %67, %66 : vector<16x128xf32>
    %69 = arith.divf %67, %68 : vector<16x128xf32>
    %70 = vector.extract_strided_slice %69 {offsets = [0, 0], sizes = [16, 64], strides = [1, 1]} : vector<16x128xf32> to vector<16x64xf32>
    %71 = vector.extract_strided_slice %69 {offsets = [0, 64], sizes = [16, 64], strides = [1, 1]} : vector<16x128xf32> to vector<16x64xf32>
    %72 = vector.extract_strided_slice %63 {offsets = [0, 128], sizes = [16, 64], strides = [1, 1]} : vector<16x192xf32> to vector<16x64xf32>
    %c14_40 = arith.constant 14 : index
    %c0_41 = arith.constant 0 : index
    %73 = vector.load %arg5[%c14_40, %c0_41] : memref<88x192xf32, #tpu.memory_space<vmem>>, vector<1x64xf32>
    %74 = vector.broadcast %73 : vector<1x64xf32> to vector<16x64xf32>
    %75 = arith.mulf %70, %74 : vector<16x64xf32>
    %76 = arith.addf %72, %75 : vector<16x64xf32>
    %77 = math.tanh %76 : vector<16x64xf32>
    %cst_42 = arith.constant 1.000000e+00 : f32
    %78 = vector.broadcast %cst_42 : f32 to vector<16x64xf32>
    %79 = arith.subf %78, %71 : vector<16x64xf32>
    %80 = arith.mulf %79, %77 : vector<16x64xf32>
    %c24_43 = arith.constant 24 : index
    %c184 = arith.constant 184 : index
    %81 = vector.load %arg5[%c24_43, %c184] : memref<88x192xf32, #tpu.memory_space<vmem>>, vector<64x1xf32>
    %cst_44 = arith.constant dense<0.000000e+00> : vector<16x1xf32>
    %82 = tpu.matmul %80, %81, %cst_44 {dimension_numbers = #tpu.dot_dimension_numbers<[1], [0], [0], [1], [0, 0, 1, 1], [], []>} : vector<16x64xf32>, vector<64x1xf32>, vector<16x1xf32> -> vector<16x1xf32>
    %c14_45 = arith.constant 14 : index
    %c77 = arith.constant 77 : index
    %83 = vector.load %arg5[%c14_45, %c77] : memref<88x192xf32, #tpu.memory_space<vmem>>, vector<1x1xf32>
    %84 = vector.broadcast %83 : vector<1x1xf32> to vector<16x1xf32>
    %85 = arith.addf %82, %84 : vector<16x1xf32>
    %c0_46 = arith.constant 0 : index
    %c0_47 = arith.constant 0 : index
    %86 = vector.load %arg6[%c0_46, %c0_47] : memref<16x1xf32, #tpu.memory_space<vmem>>, vector<16x1xf32>
    tpu.vector_store %arg6[%c0_46, %c0_47], %85 {strides = array<i32>} : memref<16x1xf32, #tpu.memory_space<vmem>>, vector<16x1xf32>,
    return
  }
  func.func @transform_0(%arg0: i32) -> (i32, i32) {
    %c0_i32 = arith.constant 0 : i32
    %c0_i32_0 = arith.constant 0 : i32
    %c0_i32_1 = arith.constant 0 : i32
    return %c0_i32, %c0_i32_0 : i32, i32
  }
  func.func @transform_1(%arg0: i32) -> (i32, i32) {
    %c0_i32 = arith.constant 0 : i32
    %c0_i32_0 = arith.constant 0 : i32
    %c0_i32_1 = arith.constant 0 : i32
    return %c0_i32, %c0_i32_0 : i32, i32
  }
  func.func @transform_2(%arg0: i32) -> (i32, i32) {
    %c0_i32 = arith.constant 0 : i32
    %c0_i32_0 = arith.constant 0 : i32
    %c0_i32_1 = arith.constant 0 : i32
    return %c0_i32, %c0_i32_0 : i32, i32
  }
  func.func @transform_3(%arg0: i32) -> (i32, i32) {
    %c0_i32 = arith.constant 0 : i32
    %c0_i32_0 = arith.constant 0 : i32
    %c0_i32_1 = arith.constant 0 : i32
    return %c0_i32, %c0_i32_0 : i32, i32
  }
  func.func @transform_4(%arg0: i32) -> (i32, i32) {
    %c0_i32 = arith.constant 0 : i32
    %c0_i32_0 = arith.constant 0 : i32
    %c0_i32_1 = arith.constant 0 : i32
    return %c0_i32, %c0_i32_0 : i32, i32
  }
  func.func @transform_5(%arg0: i32) -> (i32, i32) {
    %c0_i32 = arith.constant 0 : i32
    %c0_i32_0 = arith.constant 0 : i32
    %c0_i32_1 = arith.constant 0 : i32
    return %c0_i32, %c0_i32_0 : i32, i32
  }
}

</mosaic_0001>

<bundles_post_ra>
// kernel: tpu_custom_call.1
= control target key start
LH: loop header
LB: loop body
LE: loop exit
PB: predicated region body
PF: predicated region fallthrough
CT: control target
= control target key end

     0   :  { %10 = vsyncpa [#allocation3], 0  ;;  %s1846_s18 = smov [#allocation2]   ;;  %s2033_s0 = inlined_call_operand.vmem [shape: f32[16,8], index: 0, kind: input, shape index: {}]   ;;  %s2034_s1 = inlined_call_operand.vmem [shape: f32[8,16], index: 1, kind: input, shape index: {}]   ;;  %s2035_s2 = inlined_call_operand.vmem [shape: f32[32,16], index: 2, kind: input, shape index: {}]   ;;  %s2036_s3 = inlined_call_operand.vmem [shape: f32[2,128], index: 3, kind: input, shape index: {}]   ;;  %s2037_s4 = inlined_call_operand.hbm [shape: f32[88,192], index: 4, kind: input, shape index: {}]   ;;  %s2038_s5 = inlined_call_operand.vmem [shape: f32[16,1], index: 5, kind: output, shape index: {}]  }
   0x1   :  { %s24_s19 = sshll.u32 %s1846_s18, 4  ;;  %s25_s19 = int_to_ptr.vmem [resolvable:$true] %s24_s19 }
   0x2   :  { %s1832_s20 = scalar_lea.vmem %s25_s19, 2816  ;;  %p1837_p1 = scmp.lt.s32.totalorder %s25_s19, %s25_s19 }
   0x3   :  { %p1833_p0 = scmp.ne.s32.totalorder %s25_s19, %s1832_s20  ;;  %p1838_p2 = scmp.lt.s32.totalorder %s1832_s20, %s1832_s20 }
   0x5   :  { %p1839_p3 = por %p1838_p2, %p1837_p1 }
   0x7   :  { %p1840_p4 = pnand %p1839_p3, %p1833_p0 }
   0x9   :  { %1843 = shalt.err (!%p1840_p4)
}
   0xa   :  { %s1847_s21 = smov 256   ;;  %s1848_s22 = smov 16  }
   0xb   :  { %30 = dma.hbm_to_vmem [thread:$0]  %s2037_s4, 2816, %s25_s19, [#allocation3], %s1847_s21, %s1847_s21, %s1848_s22  }
   0xc   :  { %1844 = dma.done.wait [#allocation3], 2816  }
   0xd   :  { %1845 = vsyncadd [#allocation3], 4294964480  ;;  %vm47_vm0 = vcmask 64512   ;;  %v1892_v0 = vld [vmem:[#allocation2 + $0x78] sm:$0xff]  ;;  %v34_v1 = vld [vmem:[%s2033_s0] sm:$0xff]  ;;  %s1849_s27 = smov 120  }
   0xe   :  { %44 = vrot.lane.b32.xlu0 %v1892_v0, %s1849_s27  ;;  %1638 = vmatprep.mubr.msk.f32.mxu0 %vm47_vm0, %v34_v1  ;;  %s1850_s28 = smov 112   ;;  %v35_v3 = vld [vmem:[%s2033_s0 + $0x8] sm:$0xff]  ;;  %v37_v4 = vld [vmem:[%s2035_s2] sm:$0xff]  ;;  %vm129_vm1 = vcmask 130048   ;;  %v1851_v5 = vmov 0.0   ;;  %vm1852_vm2 = vmmov 0  }
   0xf   :  { %1653 = vmatprep.subr.mxu1 %v1851_v5  ;;  %1657 = vmatprep.mubr.msk.f32.mxu1 %vm1852_vm2, %v1851_v5  ;;  %v38_v8 = vld [vmem:[%s2035_s2 + $0x8] sm:$0xff]  ;;  %v36_v9 = vld [vmem:[%s2034_s1] sm:$0xff]  ;;  %v40_v11 = vld [vmem:[%s2035_s2 + $0x18] sm:$0xff]  ;;  %s1853_s13 = smov 88   ;;  %vm721_vm3 = vcmask 1041408   ;;  %vm712_vm4 = vcmask 15360  }
  0x10   :  { %1654 = vmatpush3.msra.mxu1 %v40_v11  ;;  %v39_v12 = vld [vmem:[%s2035_s2 + $0x10] sm:$0xff]  ;;  %v1933_v17 = vld [vmem:[#allocation2 + $0x38] sm:$0xff]  ;;  %v1941_v19 = vld [vmem:[#allocation2 + $0x48] sm:$0xff]  ;;  %vm862_vm5 = vcmask 261120   ;;  %v1854_v45 = vmov 42   ;;  %s1856_s15 = smov 64  }
  0x11   :  { %1655 = vmatprep.subr.mxu1 %v1851_v5  ;;  %v1937_v18 = vld [vmem:[#allocation2 + $0x58] sm:$0xff]  ;;  %704 = vrot.lane.b32.xlu1 %v1933_v17, %s1853_s13  ;;  %v1946_v20 = vld [vmem:[#allocation2 + $0x68] sm:$0xff]  ;;  %v501_v27 = vld [vmem:[#allocation2 + $0x60] sm:$0xff]  ;;  %vm1263_vm6 = vcmask 1044480   ;;  %vm1256_vm7 = vcmask 105472   ;;  %s1857_s16 = smov 72  }
  0x12   :  { %213 = vrot.lane.b32.xlu0 %v1892_v0, %s1850_s28  ;;  %1656 = vmatpush3.msra.mxu1 %v39_v12  ;;  %v1963_v24 = vld [vmem:[#allocation2 + $0x88] sm:$0xff]  ;;  %v1965_v25 = vld [vmem:[#allocation2 + $0x98] sm:$0xff]  ;;  %v41_v28 = vld [vmem:[%s2036_s3] sm:$0x3]  ;;  %s1855_s3 = smov 85   ;;  %s1858_s17 = smov 51  }
  0x13   :  { %v1971_v26 = vld [vmem:[#allocation2 + $0xa8] sm:$0xff]  ;;  %1674 = vmatprep.subr.mxu1 %v501_v27  ;;  %v500_v29 = vld [vmem:[#allocation2 + $0x50] sm:$0xff]  ;;  %v499_v30 = vld [vmem:[#allocation2 + $0x40] sm:$0xff]  ;;  %1771 = vset.pattern.permute.xlu1 %v1854_v45  ;;  %vm1427_vm8 = vcmask 523264   ;;  %vm1507_vm9 = vcmask 7168  }
  0x14   :  { %v498_v41 = vld [vmem:[#allocation2 + $0x30] sm:$0xff]  ;;  %1770 = vset.pattern.permute.xlu0 %v1854_v45 }
  0x15   :  { %706 = vrot.lane.b32.xlu1 %v1941_v19, %s1853_s13 }
  0x16   :  { %708 = vrot.lane.b32.xlu0 %v1937_v18, %s1853_s13 }
  0x19   :  { %710 = vrot.lane.b32.xlu1 %v1946_v20, %s1853_s13 }
  0x1a   :  { %854 = vrot.lane.b32.xlu0 %v1933_v17, %s1849_s27 }
  0x1d   :  { %856 = vrot.lane.b32.xlu1 %v1941_v19, %s1849_s27 }
  0x1e   :  { %858 = vrot.lane.b32.xlu0 %v1937_v18, %s1849_s27 }
  0x21   :  { %860 = vrot.lane.b32.xlu1 %v1946_v20, %s1849_s27 }
  0x22   :  { %851 = vperm.xlu0 %1770, %v1946_v20  }
  0x25   :  { %847 = vperm.xlu1 %1771, %v1937_v18  }
  0x26   :  { %839 = vperm.xlu0 %1770, %v1933_v17  }
  0x29   :  { %843 = vperm.xlu1 %1771, %v1941_v19  }
  0x2a   :  { %1062 = vrot.lane.b32.xlu0 %v1937_v18, %s1855_s3 }
  0x2d   :  { %1064 = vrot.lane.b32.xlu1 %v1946_v20, %s1855_s3 }
  0x2e   :  { %1058 = vrot.lane.b32.xlu0 %v1933_v17, %s1855_s3 }
  0x31   :  { %1060 = vrot.lane.b32.xlu1 %v1941_v19, %s1855_s3 }
  0x80   :  { %v45_v2 = vpop.permute.xlu0 %44 }
  0x81   :  { %1636 = vmatprep.subr.mxu0 %v45_v2 }
  0x82   :  { %1637 = vmatpush3.msra.mxu0 %v45_v2 }
  0x83   :  { %1639 = vmatmul.mubr.msk.f32.vlgmr.msra.gmra.mxu0 %vm47_vm0, %v35_v3  ;;  %v705_v31 = vpop.permute.xlu1 %704 }
  0x84   :  { %1645 = vmatprep.mubr.msk.f32.mxu0 %vm129_vm1, %v37_v4  ;;  %v214_v10 = vpop.permute.xlu0 %213 }
  0x87   :  { %v707_v32 = vpop.permute.xlu1 %706 }
  0x88   :  { %v709_v33 = vpop.permute.xlu0 %708 }
  0x8b   :  { %v711_v34 = vpop.permute.xlu1 %710 }
  0x8c   :  { %v855_v44 = vpop.permute.xlu0 %854 }
 0x143   :  { %v1640_v6 = vpop.f32.mrf.mxu0 }
 0x144   :  { %1641 = vmatprep.subr.mxu0 %v1640_v6 }
 0x145   :  { %v120_v7 = vpop.f32.mrf.mxu0  ;;  %1642 = vmatpush3.msra.mxu0 %v1640_v6 }
 0x146   :  { %1643 = vmatprep.subr.mxu0 %v120_v7 }
 0x147   :  { %1644 = vmatpush3.msra.mxu0 %v120_v7 }
 0x148   :  { %1646 = vmatmul.mubr.msk.f32.vlgmr.msra.gmra.mxu0 %vm129_vm1, %v38_v8  ;;  %1648 = vmatprep.subr.mxu0 %v1851_v5 }
 0x149   :  { %1649 = vmatpush3.msra.mxu0 %v36_v9  ;;  %1650 = vmatprep.mubr.msk.f32.mxu0 %vm1852_vm2, %v1851_v5 }
 0x14c   :  { %1651 = vmatmul.mubr.msk.f32.vlgmr.msra.gmra.mxu0 %vm47_vm0, %v214_v10 }
 0x14d   :  { %1662 = vmatprep.mubr.msk.f32.mxu0 %vm47_vm0, %v1933_v17 }
 0x208   :  { %v1928_v13 = vpop.f32.mrf.mxu0 }
 0x20a   :  { %v1930_v14 = vpop.f32.mrf.mxu0 }
 0x20c   :  { %v283_v15 = vpop.f32.mrf.mxu0 }
 0x20d   :  { %1658 = vmatmul.mubr.msk.f32.vlgmr.msra.gmra.mxu1 %vm129_vm1, %v283_v15 }
 0x20e   :  { %v1652_v16 = vpop.f32.mrf.mxu0  ;;  %1675 = vmatpush3.msra.mxu1 %v501_v27 }
 0x20f   :  { %1676 = vmatprep.subr.mxu1 %v500_v29 }
 0x210   :  { %1677 = vmatpush3.msra.mxu1 %v500_v29 }
 0x211   :  { %1684 = vmatprep.subr.mxu1 %v499_v30 }
 0x2cd   :  { %v356_v21 = vpop.f32.mrf.mxu1 }
 0x2ce   :  { %v360_v22 = vmax.f32 %v356_v21, 0.0 }
 0x2cf   :  { %v1659_v23 = vpop.f32.mrf.mxu1 }
 0x2d0   :  { %1660 = vmatprep.subr.mxu0 %v360_v22 }
 0x2d1   :  { %1661 = vmatpush3.msra.mxu0 %v360_v22 }
 0x2d2   :  { %1663 = vmatmul.mubr.msk.f32.vlgmr.msra.gmra.mxu0 %vm47_vm0, %v1941_v19  ;;  %1694 = vmatprep.subr.msk.mxu0 %vm721_vm3, %v41_v28 }
 0x2d3   :  { %1665 = vmatprep.mubr.msk.f32.mxu0 %vm47_vm0, %v1937_v18  ;;  %1695 = vmatpush3.msk.msra.mxu0 %vm721_vm3, %v41_v28  ;;  %v857_v28 = vpop.permute.xlu1 %856 }
 0x2d6   :  { %1666 = vmatmul.mubr.msk.f32.gmra.mxu0 %vm47_vm0, %v1946_v20 }
 0x2d7   :  { %1668 = vmatprep.mubr.msk.f32.mxu0 %vm47_vm0, %v1892_v0 }
 0x2da   :  { %1669 = vmatmul.mubr.msk.f32.gmra.mxu0 %vm47_vm0, %v1963_v24 }
 0x2db   :  { %1671 = vmatprep.mubr.msk.f32.mxu0 %vm47_vm0, %v1965_v25 }
 0x2de   :  { %1672 = vmatmul.mubr.msk.f32.gmra.mxu0 %vm47_vm0, %v1971_v26 }
 0x2df   :  { %1696 = vmatprep.mubr.msk.f32.mxu0 %vm712_vm4, %v705_v31  ;;  %v861_v31 = vpop.permute.xlu1 %860 }
 0x2e2   :  { %1697 = vmatmul.mubr.msk.f32.vlgmr.msra.gmra.mxu0 %vm712_vm4, %v707_v32  ;;  %v980_v32 = vld [vmem:[#allocation2 + $0x70] sm:$0xff] }
 0x2e3   :  { %1699 = vmatprep.mubr.msk.f32.mxu0 %vm712_vm4, %v709_v33  ;;  %v848_v33 = vpop.permute.xlu1 %847 }
 0x2e6   :  { %1700 = vmatmul.mubr.msk.f32.gmra.mxu0 %vm712_vm4, %v711_v34 }
 0x2e7   :  { %1724 = vmatprep.mubr.f32.mxu0 %v980_v32 }
 0x392   :  { %v1664_v35 = vpop.f32.mrf.mxu0 }
 0x394   :  { %v459_v36 = vpop.f32.mrf.mxu0 }
 0x396   :  { %v1667_v37 = vpop.f32.mrf.mxu0 }
 0x398   :  { %v469_v38 = vpop.f32.mrf.mxu0 }
 0x39a   :  { %v1670_v39 = vpop.f32.mrf.mxu0 }
 0x39c   :  { %v479_v40 = vpop.f32.mrf.mxu0 }
 0x39d   :  { %1678 = vmatprep.mubr.msk.f32.mxu1 %vm129_vm1, %v479_v40 }
 0x39e   :  { %v1673_v42 = vpop.f32.mrf.mxu0  ;;  %1679 = vmatmul.mubr.msk.f32.vlgmr.msra.gmra.mxu1 %vm129_vm1, %v1670_v39 }
 0x39f   :  { %1685 = vmatpush3.msra.mxu1 %v499_v30  ;;  %v859_v30 = vpop.permute.xlu0 %858 }
 0x3a0   :  { %v489_v43 = vpop.f32.mrf.mxu0  ;;  %1686 = vmatprep.subr.mxu1 %v498_v41 }
 0x3a1   :  { %1681 = vmatprep.mubr.msk.f32.mxu1 %vm129_vm1, %v489_v43  ;;  %1687 = vmatpush3.msra.mxu1 %v498_v41 }
 0x3a2   :  { %1682 = vmatmul.mubr.msk.f32.gmra.mxu1 %vm129_vm1, %v1673_v42  ;;  %v1698_v49 = vpop.f32.mrf.mxu0 }
 0x3a3   :  { %1688 = vmatprep.mubr.msk.f32.mxu1 %vm129_vm1, %v459_v36  ;;  %v852_v34 = vpop.permute.xlu0 %851 }
 0x3a4   :  { %v791_v52 = vpop.f32.mrf.mxu0 }
 0x3a6   :  { %1689 = vmatmul.mubr.msk.f32.vlgmr.msra.gmra.mxu1 %vm129_vm1, %v1664_v35  ;;  %v1701_v58 = vpop.f32.mrf.mxu0  ;;  %v844_v35 = vpop.permute.xlu1 %843 }
 0x3a7   :  { %1691 = vmatprep.mubr.msk.f32.mxu1 %vm129_vm1, %v469_v38  ;;  %v840_v39 = vpop.permute.xlu0 %839 }
 0x3a8   :  { %v801_v3 = vpop.f32.mrf.mxu0 }
 0x3aa   :  { %1692 = vmatmul.mubr.msk.f32.gmra.mxu1 %vm129_vm1, %v1667_v37 }
 0x3ab   :  { %1710 = vmatprep.mubr.msk.f32.mxu1 %vm862_vm5, %v855_v44 }
 0x45e   :  { %v1680_v46 = vpop.f32.mrf.mxu1 }
 0x460   :  { %v580_v47 = vpop.f32.mrf.mxu1 }
 0x462   :  { %v1683_v48 = vpop.f32.mrf.mxu1 }
 0x464   :  { %v590_v50 = vpop.f32.mrf.mxu1 }
 0x466   :  { %v1690_v51 = vpop.f32.mrf.mxu1 }
 0x467   :  { %v683_v53 = vadd.f32 %v1690_v51, %v1680_v46 }
 0x468   :  { %v677_v54 = vpop.f32.mrf.mxu1 }
 0x469   :  { %v678_v55 = vadd.f32 %v677_v54, %v580_v47  ;;  %v811_v56 = vadd.f32 %v1698_v49, %v683_v53 }
 0x46a   :  { %v1693_v57 = vpop.f32.mrf.mxu1 }
 0x46b   :  { %v693_v59 = vadd.f32 %v1693_v57, %v1683_v48  ;;  %v810_v60 = vadd.f32 %v791_v52, %v678_v55  ;;  %v1543_v61 = vmul.f32 -1.442695, %v811_v56 }
 0x46c   :  { %v687_v62 = vpop.f32.mrf.mxu1 }
 0x46d   :  { %v688_v63 = vadd.f32 %v687_v62, %v590_v50  ;;  %v813_v1 = vadd.f32 %v1701_v58, %v693_v59  ;;  %v1542_v2 = vmul.f32 -1.442695, %v810_v60  ;;  %1772 = vpow2.f32 %v1543_v61  ;;  %v1065_v59 = vpop.permute.xlu1 %1064  ;;  %v1063_v60 = vpop.permute.xlu0 %1062 }
 0x46f   :  { %v1545_v4 = vmul.f32 -1.442695, %v813_v1  ;;  %v812_v6 = vadd.f32 %v801_v3, %v688_v63  ;;  %v981_v1 = vld [vmem:[#allocation2 + $0x80] sm:$0xff]  ;;  %v1172_v3 = vld [vmem:[#allocation2 + $0x28] sm:$0xff] }
 0x471   :  { %1774 = vpow2.f32 %v1545_v4  ;;  %v1544_v7 = vmul.f32 -1.442695, %v812_v6  ;;  %v1061_v62 = vpop.permute.xlu1 %1060  ;;  %v1999_v4 = vld [vmem:[#allocation2 + $0x16] ss:$0 sm:$0xff] }
 0x472   :  { %1776 = vpow2.f32 %v1542_v2  ;;  %v1059_v2 = vpop.permute.xlu0 %1058  ;;  %1071 = vrot.lane.b32.xlu1 %v1999_v4, %s1856_s15 }
 0x473   :  { %1778 = vpow2.f32 %v1544_v7 }
 0x47a   :  { %v1773_v8 = vpop.eup %1772 }
 0x47b   :  { %v827_v15 = vadd.f32 1.0, %v1773_v8  ;;  %v1171_v8 = vld [vmem:[#allocation2 + $0x20] sm:$0xff] }
 0x47e   :  { %v1775_v9 = vpop.eup %1774 }
 0x47f   :  { %v1777_v10 = vpop.eup %1776  ;;  %v829_v11 = vadd.f32 1.0, %v1775_v9  ;;  %v211_v9 = vmax.f32 %v1930_v14, 0.0 }
 0x480   :  { %v1779_v12 = vpop.eup %1778  ;;  %v826_v21 = vadd.f32 1.0, %v1777_v10  ;;  %v212_v10 = vmax.f32 %v1928_v13, 0.0 }
 0x481   :  { %1780 = vrcp.f32 %v829_v11  ;;  %v828_v16 = vadd.f32 1.0, %v1779_v12  ;;  %v1170_v11 = vld [vmem:[#allocation2 + $0x18] sm:$0x1f]  ;;  %v1169_v12 = vld [vmem:[#allocation2 + $0x10] sm:$0x1f] }
 0x483   :  { %1782 = vrcp.f32 %v828_v16  ;;  %v1167_v16 = vld [vmem:[#allocation2] sm:$0xff] }
 0x484   :  { %1784 = vrcp.f32 %v827_v15  ;;  %v1168_v15 = vld [vmem:[#allocation2 + $0x8] sm:$0xff] }
 0x485   :  { %1786 = vrcp.f32 %v826_v21 }
 0x48e   :  { %v1781_v22 = vpop.eup %1780 }
 0x48f   :  { %1702 = vmatprep.subr.mxu1 %v1781_v22 }
 0x490   :  { %v1783_v23 = vpop.eup %1782  ;;  %1703 = vmatpush3.msra.mxu1 %v1781_v22 }
 0x491   :  { %1704 = vmatprep.subr.mxu1 %v1783_v23  ;;  %v1785_v27 = vpop.eup %1784 }
 0x492   :  { %1705 = vmatpush3.msra.mxu1 %v1783_v23  ;;  %v1787_v29 = vpop.eup %1786 }
 0x493   :  { %1706 = vmatprep.subr.mxu1 %v1785_v27 }
 0x494   :  { %1707 = vmatpush3.msra.mxu1 %v1785_v27 }
 0x495   :  { %1708 = vmatprep.subr.mxu1 %v1787_v29 }
 0x496   :  { %1709 = vmatpush3.msra.mxu1 %v1787_v29 }
 0x497   :  { %1711 = vmatmul.mubr.msk.f32.vlgmr.msra.gmra.mxu1 %vm862_vm5, %v857_v28  ;;  %1727 = vmatprep.subr.mxu1 %v1065_v59 }
 0x498   :  { %1713 = vmatprep.mubr.msk.f32.mxu1 %vm862_vm5, %v859_v30  ;;  %1728 = vmatpush3.msra.mxu1 %v1065_v59 }
 0x499   :  { %1729 = vmatprep.subr.mxu1 %v1063_v60 }
 0x49a   :  { %1730 = vmatpush3.msra.mxu1 %v1063_v60 }
 0x49b   :  { %1714 = vmatmul.mubr.msk.f32.gmra.mxu1 %vm862_vm5, %v861_v31  ;;  %1731 = vmatprep.subr.mxu1 %v1061_v62 }
 0x49c   :  { %1732 = vmatpush3.msra.mxu1 %v1061_v62 }
 0x49d   :  { %1733 = vmatprep.subr.mxu1 %v1059_v2 }
 0x49e   :  { %1734 = vmatpush3.msra.mxu1 %v1059_v2 }
 0x49f   :  { %1209 = vmatprep.subr.mxu1 %v1172_v3 }
 0x4e4   :  { %v1072_v21 = vpop.permute.xlu1 %1071 }
 0x557   :  { %v1712_v36 = vpop.f32.mrf.mxu1 }
 0x558   :  { %v943_v38 = vadd.f32 %v1712_v36, %v844_v35  ;;  %v1350_v35 = vlaneseq }
 0x559   :  { %v937_v37 = vpop.f32.mrf.mxu1 }
 0x55a   :  { %v1551_v42 = vmul.f32 -1.442695, %v943_v38  ;;  %v938_v44 = vadd.f32 %v937_v37, %v840_v39  ;;  %v1351_v36 = vshrl.u32 %v1350_v35, 7  ;;  %v1348_v39 = vld [vmem:[#allocation2 + $0x15] ss:$8 sm:$0x3] }
 0x55b   :  { %v1715_v40 = vpop.f32.mrf.mxu1 }
 0x55c   :  { %v953_v41 = vadd.f32 %v1715_v40, %v852_v34  ;;  %v1550_v48 = vmul.f32 -1.442695, %v938_v44  ;;  %v1352_v37 = vsub.s32 0, %v1351_v36 }
 0x55d   :  { %v947_v43 = vpop.f32.mrf.mxu1 }
 0x55e   :  { %v1553_v45 = vmul.f32 -1.442695, %v953_v41  ;;  %v948_v46 = vadd.f32 %v947_v43, %v848_v33  ;;  %v1353_v40 = vrot.slane %v1348_v39, %v1352_v37 }
 0x560   :  { %1788 = vpow2.f32 %v1553_v45  ;;  %v1552_v47 = vmul.f32 -1.442695, %v948_v46 }
 0x561   :  { %1790 = vpow2.f32 %v1551_v42 }
 0x562   :  { %1792 = vpow2.f32 %v1552_v47 }
 0x563   :  { %1794 = vpow2.f32 %v1550_v48 }
 0x56d   :  { %v1789_v49 = vpop.eup %1788 }
 0x56e   :  { %v1791_v50 = vpop.eup %1790  ;;  %v971_v51 = vadd.f32 1.0, %v1789_v49 }
 0x56f   :  { %v1793_v52 = vpop.eup %1792  ;;  %v969_v54 = vadd.f32 1.0, %v1791_v50 }
 0x570   :  { %1796 = vrcp.f32 %v971_v51  ;;  %v970_v53 = vadd.f32 1.0, %v1793_v52  ;;  %v1795_v55 = vpop.eup %1794 }
 0x571   :  { %v968_v56 = vadd.f32 1.0, %v1795_v55  ;;  %v1356_v55 = vsub.s32 1, %v1351_v36 }
 0x572   :  { %1798 = vrcp.f32 %v970_v53 }
 0x573   :  { %1800 = vrcp.f32 %v969_v54 }
 0x574   :  { %1802 = vrcp.f32 %v968_v56 }
 0x57d   :  { %v1797_v57 = vpop.eup %1796 }
 0x57e   :  { %1716 = vmatprep.subr.mxu0 %v1797_v57 }
 0x57f   :  { %v1799_v58 = vpop.eup %1798  ;;  %1717 = vmatpush3.xpose.msra.mxu0 %v1797_v57  ;;  %v1357_v57 = vrot.slane %v1348_v39, %v1356_v55 }
 0x580   :  { %1718 = vmatprep.subr.mxu0 %v1799_v58  ;;  %v1801_v61 = vpop.eup %1800 }
 0x581   :  { %v1803_v63 = vpop.eup %1802 }
 0x583   :  { %1719 = vmatpush3.xpose.msra.mxu0 %v1799_v58 }
 0x584   :  { %1720 = vmatprep.subr.mxu0 %v1801_v61 }
 0x587   :  { %1721 = vmatpush3.xpose.msra.mxu0 %v1801_v61 }
 0x588   :  { %1722 = vmatprep.subr.mxu0 %v1803_v63 }
 0x58b   :  { %1723 = vmatpush3.xpose.msra.mxu0 %v1803_v63 }
 0x58c   :  { %1560 = vmatprep.subr.msk.mxu0 %vm1263_vm6, %v1170_v11 }
 0x58e   :  { %1725 = vmatmul.mubr.f32.vlgmr.msra.gmra.mxu0 %v981_v1 }
 0x58f   :  { %1334 = vmatprep.mubr.f32.mxu0 %v1851_v5  ;;  %1561 = vmatpush1.msk.msra.mxu0 %vm1263_vm6, %v1169_v12 }
 0x590   :  { %1300 = vmatprep.subr.mxu0 %v1168_v15 }
 0x591   :  { %1301 = vmatpush1.msra.mxu0 %v1167_v16 }
 0x64e   :  { %v1726_v6 = vpop.f32.mrf.mxu0 }
 0x650   :  { %v1048_v7 = vpop.f32.mrf.mxu0 }
 0x651   :  { %1735 = vmatprep.mubr.msk.f32.mxu1 %vm862_vm5, %v1048_v7 }
 0x652   :  { %1736 = vmatmul.mubr.msk.f32.vlgmr.msra.gmra.mxu1 %vm862_vm5, %v1726_v6 }
 0x653   :  { %1210 = vmatpush1.msra.mxu1 %v1171_v8  ;;  %1243 = vmatprep.mubr.f32.mxu1 %v1851_v5 }
 0x656   :  { %1558 = vmatmul.mubr.msk.f32.vlgmr.msra.gmra.mxu1 %vm47_vm0, %v211_v9 }
 0x657   :  { %1249 = vmatprep.mubr.f32.mxu1 %v1851_v5 }
 0x65a   :  { %1559 = vmatmul.mubr.msk.f32.gmra.mxu1 %vm47_vm0, %v212_v10 }
 0x712   :  { %v1737_v22 = vpop.f32.mrf.mxu1 }
 0x713   :  { %v1152_v14 = vadd.f32 %v1737_v22, %v1072_v21 }
 0x714   :  { %v1146_v23 = vpop.f32.mrf.mxu1 }
 0x715   :  { %v1557_v27 = vmul.f32 -1.442695, %v1152_v14  ;;  %v1147_v28 = vadd.f32 %v1146_v23, %v1072_v21 }
 0x716   :  { %v1245_v38 = vpop.f32.mrf.mxu1 }
 0x717   :  { %v1556_v29 = vmul.f32 -1.442695, %v1147_v28  ;;  %1804 = vpow2.f32 %v1557_v27 }
 0x718   :  { %v1247_v41 = vpop.f32.mrf.mxu1 }
 0x719   :  { %1806 = vpow2.f32 %v1556_v29 }
 0x71a   :  { %v1251_v46 = vpop.f32.mrf.mxu1 }
 0x71c   :  { %v1253_v60 = vpop.f32.mrf.mxu1 }
 0x724   :  { %v1805_v13 = vpop.eup %1804 }
 0x725   :  { %v1162_v32 = vadd.f32 1.0, %v1805_v13 }
 0x726   :  { %v1807_v30 = vpop.eup %1806 }
 0x727   :  { %v1161_v31 = vadd.f32 1.0, %v1807_v30 }
 0x729   :  { %1808 = vrcp.f32 %v1161_v31 }
 0x72a   :  { %1810 = vrcp.f32 %v1162_v32 }
 0x736   :  { %v1809_v33 = vpop.eup %1808 }
 0x737   :  { %1562 = vmatmul.mubr.msk.f32.vlgmr.msra.gmra.mxu0 %vm1256_vm7, %v1809_v33  ;;  %v1811_v34 = vpop.eup %1810 }
 0x738   :  { %1340 = vmatprep.mubr.f32.mxu0 %v1851_v5 }
 0x73b   :  { %1563 = vmatmul.mubr.msk.f32.gmra.mxu0 %vm1256_vm7, %v1811_v34 }
 0x7f7   :  { %v1336_v42 = vpop.f32.mrf.mxu0 }
 0x7f8   :  { %v1337_v43 = vadd.f32 %v1336_v42, %v1245_v38 }
 0x7f9   :  { %v1338_v44 = vpop.f32.mrf.mxu0 }
 0x7fa   :  { %v1360_v45 = vadd.f32 %v1353_v40, %v1337_v43  ;;  %v1339_v56 = vadd.f32 %v1338_v44, %v1247_v41 }
 0x7fb   :  { %v1342_v47 = vpop.f32.mrf.mxu0 }
 0x7fc   :  { %v1564_v48 = vmul.f32 -1.442695, %v1360_v45  ;;  %v1343_v49 = vadd.f32 %v1342_v47, %v1251_v46  ;;  %v1361_v61 = vadd.f32 %v1357_v57, %v1339_v56 }
 0x7fd   :  { %v1344_v58 = vpop.f32.mrf.mxu0 }
 0x7fe   :  { %1812 = vpow2.f32 %v1564_v48  ;;  %v1362_v50 = vadd.f32 %v1353_v40, %v1343_v49  ;;  %v1345_v63 = vadd.f32 %v1344_v58, %v1253_v60 }
 0x800   :  { %v1565_v5 = vmul.f32 -1.442695, %v1362_v50  ;;  %v1363_v3 = vadd.f32 %v1357_v57, %v1345_v63 }
 0x802   :  { %1814 = vpow2.f32 %v1565_v5 }
 0x80b   :  { %v1813_v51 = vpop.eup %1812 }
 0x80c   :  { %v1370_v52 = vadd.f32 1.0, %v1813_v51 }
 0x80e   :  { %1816 = vrcp.f32 %v1370_v52 }
 0x80f   :  { %v1815_v53 = vpop.eup %1814 }
 0x810   :  { %v1371_v54 = vadd.f32 1.0, %v1815_v53 }
 0x812   :  { %1818 = vrcp.f32 %v1371_v54 }
 0x81b   :  { %v1817_v59 = vpop.eup %1816 }
 0x81c   :  { %v1376_v62 = vmul.f32 %v1817_v59, %v1999_v4  ;;  %v1382_v10 = vsub.f32 1.0, %v1817_v59 }
 0x81e   :  { %v1378_v1 = vadd.f32 %v1376_v62, %v1361_v61 }
 0x81f   :  { %v1819_v2 = vpop.eup %1818 }
 0x820   :  { %1820 = vtanh.f32 %v1378_v1  ;;  %v1377_v6 = vmul.f32 %v1819_v2, %v1999_v4 }
 0x822   :  { %v1379_v7 = vadd.f32 %v1377_v6, %v1363_v3 }
 0x824   :  { %1822 = vtanh.f32 %v1379_v7 }
 0x82d   :  { %v1821_v8 = vpop.eup %1820 }
 0x82e   :  { %1386 = vrot.lane.b32.xlu0 %v1821_v8, %s1856_s15 }
 0x831   :  { %v1823_v9 = vpop.eup %1822 }
 0x832   :  { %1388 = vrot.lane.b32.xlu1 %v1823_v9, %s1856_s15  ;;  %1414 = vrot.lane.b32.xlu0 %v1971_v26, %s1857_s16  ;;  %v1383_v26 = vsub.f32 1.0, %v1819_v2 }
 0x836   :  { %1410 = vrot.lane.b32.xlu0 %v1963_v24, %s1857_s16  ;;  %1412 = vrot.lane.b32.xlu1 %v1965_v25, %s1857_s16 }
 0x83a   :  { %1406 = vrot.lane.b32.xlu0 %v1946_v20, %s1857_s16  ;;  %1408 = vrot.lane.b32.xlu1 %v1892_v0, %s1857_s16 }
 0x83e   :  { %1402 = vrot.lane.b32.xlu0 %v1941_v19, %s1857_s16  ;;  %1404 = vrot.lane.b32.xlu1 %v1937_v18, %s1857_s16 }
 0x842   :  { %1400 = vrot.lane.b32.xlu1 %v1933_v17, %s1857_s16 }
 0x8a0   :  { %v1387_v11 = vpop.permute.xlu0 %1386 }
 0x8a1   :  { %v1392_v12 = vmul.f32 %v1387_v11, %v1382_v10 }
 0x8a3   :  { %1396 = vrot.lane.b32.xlu0 %v1392_v12, %s1856_s15 }
 0x8a4   :  { %v1389_v15 = vpop.permute.xlu1 %1388  ;;  %v1415_v24 = vpop.permute.xlu0 %1414 }
 0x8a5   :  { %v1393_v16 = vmul.f32 %v1389_v15, %v1383_v26  ;;  %1738 = vmatprep.subr.mxu1 %v1415_v24 }
 0x8a6   :  { %1739 = vmatpush3.msra.mxu1 %v1415_v24 }
 0x8a7   :  { %1398 = vrot.lane.b32.xlu1 %v1393_v16, %s1856_s15  ;;  %1424 = vrot.lane.b32.xlu0 %v1999_v4, %s1858_s17 }
 0x8a8   :  { %v1411_v0 = vpop.permute.xlu0 %1410  ;;  %v1413_v18 = vpop.permute.xlu1 %1412 }
 0x8a9   :  { %1740 = vmatprep.subr.mxu1 %v1413_v18 }
 0x8aa   :  { %1741 = vmatpush3.msra.mxu1 %v1413_v18 }
 0x8ab   :  { %1742 = vmatprep.subr.mxu1 %v1411_v0 }
 0x8ac   :  { %v1407_v17 = vpop.permute.xlu0 %1406  ;;  %v1409_v19 = vpop.permute.xlu1 %1408  ;;  %1743 = vmatpush3.msra.mxu1 %v1411_v0 }
 0x8ad   :  { %1744 = vmatprep.subr.mxu1 %v1409_v19 }
 0x8ae   :  { %1745 = vmatpush3.msra.mxu1 %v1409_v19 }
 0x8af   :  { %1746 = vmatprep.subr.mxu1 %v1407_v17 }
 0x8b0   :  { %v1403_v20 = vpop.permute.xlu0 %1402  ;;  %v1405_v25 = vpop.permute.xlu1 %1404  ;;  %1747 = vmatpush3.msra.mxu1 %v1407_v17 }
 0x8b1   :  { %1748 = vmatprep.subr.mxu1 %v1405_v25 }
 0x8b2   :  { %1749 = vmatpush3.msra.mxu1 %v1405_v25 }
 0x8b3   :  { %1750 = vmatprep.subr.mxu1 %v1403_v20 }
 0x8b4   :  { %v1401_v21 = vpop.permute.xlu1 %1400  ;;  %1751 = vmatpush3.msra.mxu1 %v1403_v20 }
 0x8b5   :  { %1752 = vmatprep.subr.mxu1 %v1401_v21 }
 0x8b6   :  { %1753 = vmatpush3.msra.mxu1 %v1401_v21 }
 0x915   :  { %v1397_v4 = vpop.permute.xlu0 %1396 }
 0x916   :  { %1754 = vmatprep.mubr.msk.f32.mxu1 %vm1427_vm8, %v1397_v4 }
 0x919   :  { %v1399_v22 = vpop.permute.xlu1 %1398  ;;  %v1425_v14 = vpop.permute.xlu0 %1424 }
 0x91a   :  { %1755 = vmatmul.mubr.msk.f32.vlgmr.msra.gmra.mxu1 %vm1427_vm8, %v1399_v22 }
 0x9da   :  { %v1756_v23 = vpop.f32.mrf.mxu1 }
 0x9db   :  { %v1504_v27 = vadd.f32 %v1756_v23, %v1425_v14 }
 0x9dc   :  { %v1498_v28 = vpop.f32.mrf.mxu1 }
 0x9dd   :  { %1509 = vst.msk [vmem:[%s2038_s5 + $0x8] sm:$0xff] %vm1507_vm9, %v1504_v27  ;;  %v1499_v29 = vadd.f32 %v1498_v28, %v1425_v14 }
 0x9df   :  { %1508 = vst.msk [vmem:[%s2038_s5] sm:$0xff] %vm1507_vm9, %v1499_v29 }
 0x9e0   :  { %1514 = vsyncpa [#allocation3], 1 }

</bundles_post_ra>
